<compile_context>
chip_gen: v6e
topology: v6e:2x2x1
jax: 0.10.0
libtpu: 0.0.40
codegen_flags: <defaults>
</compile_context>

<pallas_src>
import functools
import math

import jax
import jax.numpy as jnp
from jax import lax
from jax.experimental import pallas as pl
from jax.experimental.pallas import tpu as pltpu

INPUT_DIM = 5
HIDDEN_DIM = 128
DEFAULT_TILE_B = 2048  # multiple of 128; sweep 1024-4096 for the target batch regime


def _gelu(x, *, approximate):
    if approximate:
        # tanh GELU: exp/tanh go through the EUP slot and overlap the MXU almost
        # for free.  Slightly deviates from PyTorch's exact erf GELU -> opt-in.
        c = math.sqrt(2.0 / math.pi)
        return 0.5 * x * (1.0 + jnp.tanh(c * (x + 0.044715 * x * x * x)))
    # PyTorch nn.GELU() default = exact erf-based GELU.
    return x * 0.5 * (1.0 + lax.erf(x * (1.0 / math.sqrt(2.0))))


def surrogate_kernel(x_ref, w1_ref, b1_ref, w2_ref, b2_ref, w3_ref, b3_ref,
                     o_ref, *, approximate_gelu):
    """One batch tile: x [TB, IN] -> o [1, TB] (batch on lanes)."""
    # ---- fc1 on the VPU ---------------------------------------------------
    # MXU push count scales with M (TB/8 pushes per N tile), not K, so a K=5
    # matmul costs nearly as many vmatmul pushes as fc2 despite 25x fewer FLOPs.
    # Five broadcast rank-1 FMAs on the VPU are essentially free next to fc2.
    x = x_ref[...]                                    # [TB, IN]  f32
    w1 = w1_ref[...]                                  # [IN, H]   f32
    h = x[:, 0:1] * w1[0:1, :]                        # [TB, H]
    for k in range(1, x.shape[1]):                    # static unroll, IN = 5
        h = h + x[:, k:k + 1] * w1[k:k + 1, :]
    h = _gelu(h + b1_ref[...], approximate=approximate_gelu)

    # ---- fc2 (dominant [TB,128] @ [128,128]) on the MXU ---------------------
    # bf16 inputs by default (MXU-native), f32 accumulation; f32 weights keep
    # the exact path when matmul_dtype=jnp.float32.
    h = jnp.dot(h.astype(w2_ref.dtype), w2_ref[...],
                preferred_element_type=jnp.float32) + b2_ref[...]
    h = _gelu(h, approximate=approximate_gelu)

    # ---- fc4 (out_features = 1): VPU multiply + cross-lane reduce ----------
    # Avoids an N=1 MXU matmul; w3 is [1, H] (PyTorch layout), b3 scalar in SMEM.
    # The sublane->lane relayout in out[None, :] is filler under the MXU/VALU
    # work (checked: it is not the saturating slot at these sizes).
    out = jnp.sum(h * w3_ref[...], axis=-1) + b3_ref[0]          # [TB]
    o_ref[...] = out[None, :].astype(o_ref.dtype)                # lane-dense [1, TB]


def surrogate_net(x, params, *, tile_b=DEFAULT_TILE_B,
                  matmul_dtype=jnp.bfloat16, approximate_gelu=False):
    """x: [B, INPUT_DIM] float32 -> [B, 1] float32."""
    w1, b1, w2, b2, w3, b3 = params
    B, input_dim = x.shape
    hidden = w1.shape[1]
    assert tile_b % 128 == 0, "tile_b must be a multiple of 128 (lane-dense output)"

    # fc2 is the only MXU matmul; cast its resident weight once in the wrapper.
    # fc1 runs on the VPU in f32, so w1 stays f32 regardless of matmul_dtype.
    w2m = w2.astype(matmul_dtype)

    # Batch tile: a multiple of 128 (so the [1, tb] output stores stay unmasked),
    # capped at tile_b.
    b128 = pl.cdiv(B, 128) * 128
    tb = min(tile_b, b128)
    # v7x megacore: if the whole batch fits in one tile, split it so the grid has
    # >= 2 steps and ("parallel",) can shard the batch across both TensorCores.
    if b128 // tb < 2 and tb >= 256:
        tb = pl.cdiv(tb // 2, 128) * 128
    b_pad = pl.cdiv(B, tb) * tb
    if b_pad != B:
        # TODO(synk): for large B, mask the ragged last tile in-kernel (pl.when /
        # row mask) instead of materializing a padded copy of x.
        x = jnp.pad(x, ((0, b_pad - B), (0, 0)))

    grid = (b_pad // tb,)
    kernel = functools.partial(surrogate_kernel, approximate_gelu=approximate_gelu)
    out = pl.pallas_call(
        kernel,
        out_shape=jax.ShapeDtypeStruct((1, b_pad), jnp.float32),
        grid=grid,
        in_specs=[
            pl.BlockSpec((tb, input_dim), lambda i: (i, 0)),      # x tile (pipelined)
            pl.BlockSpec((input_dim, hidden), lambda i: (0, 0)),  # w1 (VMEM-resident, f32)
            pl.BlockSpec((1, hidden), lambda i: (0, 0)),          # b1
            pl.BlockSpec((hidden, hidden), lambda i: (0, 0)),     # w2 (bf16 by default)
            pl.BlockSpec((1, hidden), lambda i: (0, 0)),          # b2
            pl.BlockSpec((1, hidden), lambda i: (0, 0)),          # w3
            pl.BlockSpec(memory_space=pltpu.MemorySpace.SMEM),    # b3 scalar
        ],
        out_specs=pl.BlockSpec((1, tb), lambda i: (0, i)),        # lane-dense store
        compiler_params=pltpu.CompilerParams(
            dimension_semantics=("parallel",),   # megacore split on v7x
            vmem_limit_bytes=32 * 1024 * 1024,
        ),
    )(x, w1, b1, w2m, b2, w3, b3)
    # [1, b_pad] -> [B, 1]
    return out[0, :B][:, None]


def init_params(key, input_dim=INPUT_DIM, hidden_dim=HIDDEN_DIM):
    """Deterministic init mimicking nn.Linear's uniform(-1/sqrt(fan_in), +)."""
    ks = jax.random.split(key, 6)

    def unif(k, shape, fan_in):
        bound = 1.0 / math.sqrt(fan_in)
        return jax.random.uniform(k, shape, jnp.float32, -bound, bound)

    w1 = unif(ks[0], (input_dim, hidden_dim), input_dim)    # fc1.weight.T
    b1 = unif(ks[1], (1, hidden_dim), input_dim)            # fc1.bias
    w2 = unif(ks[2], (hidden_dim, hidden_dim), hidden_dim)  # fc2.weight.T
    b2 = unif(ks[3], (1, hidden_dim), hidden_dim)           # fc2.bias
    w3 = unif(ks[4], (1, hidden_dim), hidden_dim)           # fc4.weight (PyTorch layout)
    b3 = unif(ks[5], (1,), hidden_dim)                      # fc4.bias (scalar)
    return (w1, b1, w2, b2, w3, b3)


def reference(x, params, *, approximate=False):
    w1, b1, w2, b2, w3, b3 = params
    h = jax.nn.gelu(x @ w1 + b1, approximate=approximate)
    h = jax.nn.gelu(h @ w2 + b2, approximate=approximate)
    return h @ w3.T + b3[None, :]


if __name__ == "__main__":
    key = jax.random.PRNGKey(0)
    k_x, k_p, k_x2 = jax.random.split(key, 3)
    params = init_params(k_p)

    # Small batch, deliberately not a multiple of 8/128 (exercises padding path).
    B = 10
    x = jax.random.normal(k_x, (B, INPUT_DIM), jnp.float32)
    ref = reference(x, params)

    # Default fast path: bf16 MXU inputs + f32 accumulation, exact-erf GELU.
    out = jax.block_until_ready(surrogate_net(x, params))
    assert out.shape == (B, 1), out.shape
    assert jnp.allclose(out, ref, atol=3e-2, rtol=3e-2), (
        f"bf16 max abs err {jnp.max(jnp.abs(out - ref))}"
    )

    # Exact f32 path: matches the PyTorch module's numerics.
    out_f32 = jax.block_until_ready(
        surrogate_net(x, params, matmul_dtype=jnp.float32)
    )
    assert jnp.allclose(out_f32, ref, atol=1e-5, rtol=1e-5), (
        f"f32 max abs err {jnp.max(jnp.abs(out_f32 - ref))}"
    )

    # Ragged, multi-tile batch (forces a >=2-step grid and 128-multiple tiles).
    B2 = 260
    x2 = jax.random.normal(k_x2, (B2, INPUT_DIM), jnp.float32)
    ref2 = reference(x2, params)
    out2 = jax.block_until_ready(surrogate_net(x2, params, tile_b=256))
    assert out2.shape == (B2, 1), out2.shape
    assert jnp.allclose(out2, ref2, atol=3e-2, rtol=3e-2), (
        f"multi-tile max abs err {jnp.max(jnp.abs(out2 - ref2))}"
    )

    # Optional tanh-GELU (EUP-routed) fast path, checked against a tanh reference.
    out_tanh = jax.block_until_ready(
        surrogate_net(x, params, approximate_gelu=True)
    )
    ref_tanh = reference(x, params, approximate=True)
    assert jnp.allclose(out_tanh, ref_tanh, atol=3e-2, rtol=3e-2), (
        f"tanh-gelu max abs err {jnp.max(jnp.abs(out_tanh - ref_tanh))}"
    )

    print("KERNEL_OK")
</pallas_src>

<mosaic_0001>
module attributes {stable_mosaic.version = 11 : i64} {
  func.func @surrogate_kernel(%arg0: i32, %arg1: memref<128x5xf32, #tpu.memory_space<vmem>>, %arg2: memref<5x128xf32, #tpu.memory_space<vmem>>, %arg3: memref<1x128xf32, #tpu.memory_space<vmem>>, %arg4: memref<128x128xbf16, #tpu.memory_space<vmem>>, %arg5: memref<1x128xf32, #tpu.memory_space<vmem>>, %arg6: memref<1x128xf32, #tpu.memory_space<vmem>>, %arg7: memref<1xf32, #tpu.memory_space<smem>>, %arg8: memref<1x128xf32, #tpu.memory_space<vmem>>) attributes {dimension_semantics = [#tpu.dimension_semantics<parallel>], iteration_bounds = array<i64: 1>, scalar_prefetch = 0 : i64, scratch_operands = 0 : i64, tpu.core_type = #tpu.core_type<tc>, window_params = [{transform_indices = @transform_0, window_bounds = array<i64: 128, 5>}, {pipeline_mode = #tpu.pipeline_mode<synchronous>, transform_indices = @transform_1, window_bounds = array<i64: 5, 128>}, {pipeline_mode = #tpu.pipeline_mode<synchronous>, transform_indices = @transform_2, window_bounds = array<i64: 1, 128>}, {pipeline_mode = #tpu.pipeline_mode<synchronous>, transform_indices = @transform_3, window_bounds = array<i64: 128, 128>}, {pipeline_mode = #tpu.pipeline_mode<synchronous>, transform_indices = @transform_4, window_bounds = array<i64: 1, 128>}, {pipeline_mode = #tpu.pipeline_mode<synchronous>, transform_indices = @transform_5, window_bounds = array<i64: 1, 128>}, {transform_indices = @transform_6, window_bounds = array<i64: 1>}, {transform_indices = @transform_7, window_bounds = array<i64: 1, 128>}]} {
    %c0 = arith.constant 0 : index
    %c0_0 = arith.constant 0 : index
    %0 = vector.load %arg1[%c0, %c0_0] : memref<128x5xf32, #tpu.memory_space<vmem>>, vector<128x5xf32>
    %c0_1 = arith.constant 0 : index
    %c0_2 = arith.constant 0 : index
    %1 = vector.load %arg2[%c0_1, %c0_2] : memref<5x128xf32, #tpu.memory_space<vmem>>, vector<5x128xf32>
    %2 = vector.extract_strided_slice %0 {offsets = [0, 0], sizes = [128, 1], strides = [1, 1]} : vector<128x5xf32> to vector<128x1xf32>
    %3 = vector.extract_strided_slice %1 {offsets = [0, 0], sizes = [1, 128], strides = [1, 1]} : vector<5x128xf32> to vector<1x128xf32>
    %4 = vector.broadcast %2 : vector<128x1xf32> to vector<128x128xf32>
    %5 = vector.broadcast %3 : vector<1x128xf32> to vector<128x128xf32>
    %6 = arith.mulf %4, %5 : vector<128x128xf32>
    %7 = vector.extract_strided_slice %0 {offsets = [0, 1], sizes = [128, 1], strides = [1, 1]} : vector<128x5xf32> to vector<128x1xf32>
    %8 = vector.extract_strided_slice %1 {offsets = [1, 0], sizes = [1, 128], strides = [1, 1]} : vector<5x128xf32> to vector<1x128xf32>
    %9 = vector.broadcast %7 : vector<128x1xf32> to vector<128x128xf32>
    %10 = vector.broadcast %8 : vector<1x128xf32> to vector<128x128xf32>
    %11 = arith.mulf %9, %10 : vector<128x128xf32>
    %12 = arith.addf %6, %11 : vector<128x128xf32>
    %13 = vector.extract_strided_slice %0 {offsets = [0, 2], sizes = [128, 1], strides = [1, 1]} : vector<128x5xf32> to vector<128x1xf32>
    %14 = vector.extract_strided_slice %1 {offsets = [2, 0], sizes = [1, 128], strides = [1, 1]} : vector<5x128xf32> to vector<1x128xf32>
    %15 = vector.broadcast %13 : vector<128x1xf32> to vector<128x128xf32>
    %16 = vector.broadcast %14 : vector<1x128xf32> to vector<128x128xf32>
    %17 = arith.mulf %15, %16 : vector<128x128xf32>
    %18 = arith.addf %12, %17 : vector<128x128xf32>
    %19 = vector.extract_strided_slice %0 {offsets = [0, 3], sizes = [128, 1], strides = [1, 1]} : vector<128x5xf32> to vector<128x1xf32>
    %20 = vector.extract_strided_slice %1 {offsets = [3, 0], sizes = [1, 128], strides = [1, 1]} : vector<5x128xf32> to vector<1x128xf32>
    %21 = vector.broadcast %19 : vector<128x1xf32> to vector<128x128xf32>
    %22 = vector.broadcast %20 : vector<1x128xf32> to vector<128x128xf32>
    %23 = arith.mulf %21, %22 : vector<128x128xf32>
    %24 = arith.addf %18, %23 : vector<128x128xf32>
    %25 = vector.extract_strided_slice %0 {offsets = [0, 4], sizes = [128, 1], strides = [1, 1]} : vector<128x5xf32> to vector<128x1xf32>
    %26 = vector.extract_strided_slice %1 {offsets = [4, 0], sizes = [1, 128], strides = [1, 1]} : vector<5x128xf32> to vector<1x128xf32>
    %27 = vector.broadcast %25 : vector<128x1xf32> to vector<128x128xf32>
    %28 = vector.broadcast %26 : vector<1x128xf32> to vector<128x128xf32>
    %29 = arith.mulf %27, %28 : vector<128x128xf32>
    %30 = arith.addf %24, %29 : vector<128x128xf32>
    %c0_3 = arith.constant 0 : index
    %c0_4 = arith.constant 0 : index
    %31 = vector.load %arg3[%c0_3, %c0_4] : memref<1x128xf32, #tpu.memory_space<vmem>>, vector<1x128xf32>
    %32 = vector.broadcast %31 : vector<1x128xf32> to vector<128x128xf32>
    %33 = arith.addf %30, %32 : vector<128x128xf32>
    %cst = arith.constant 5.000000e-01 : f32
    %34 = vector.broadcast %cst : f32 to vector<128x128xf32>
    %35 = arith.mulf %33, %34 : vector<128x128xf32>
    %cst_5 = arith.constant 0.707106769 : f32
    %36 = vector.broadcast %cst_5 : f32 to vector<128x128xf32>
    %37 = arith.mulf %33, %36 : vector<128x128xf32>
    %38 = math.erf %37 : vector<128x128xf32>
    %cst_6 = arith.constant 1.000000e+00 : f32
    %39 = vector.broadcast %cst_6 : f32 to vector<128x128xf32>
    %40 = arith.addf %39, %38 : vector<128x128xf32>
    %41 = arith.mulf %35, %40 : vector<128x128xf32>
    %42 = arith.truncf %41 : vector<128x128xf32> to vector<128x128xbf16>
    %c0_7 = arith.constant 0 : index
    %c0_8 = arith.constant 0 : index
    %43 = vector.load %arg4[%c0_7, %c0_8] : memref<128x128xbf16, #tpu.memory_space<vmem>>, vector<128x128xbf16>
    %cst_9 = arith.constant dense<0.000000e+00> : vector<128x128xf32>
    %44 = tpu.matmul %42, %43, %cst_9 {dimension_numbers = #tpu.dot_dimension_numbers<[1], [0], [0], [1], [0, 0, 1, 1], [], []>} : vector<128x128xbf16>, vector<128x128xbf16>, vector<128x128xf32> -> vector<128x128xf32>
    %c0_10 = arith.constant 0 : index
    %c0_11 = arith.constant 0 : index
    %45 = vector.load %arg5[%c0_10, %c0_11] : memref<1x128xf32, #tpu.memory_space<vmem>>, vector<1x128xf32>
    %46 = vector.broadcast %45 : vector<1x128xf32> to vector<128x128xf32>
    %47 = arith.addf %44, %46 : vector<128x128xf32>
    %cst_12 = arith.constant 5.000000e-01 : f32
    %48 = vector.broadcast %cst_12 : f32 to vector<128x128xf32>
    %49 = arith.mulf %47, %48 : vector<128x128xf32>
    %cst_13 = arith.constant 0.707106769 : f32
    %50 = vector.broadcast %cst_13 : f32 to vector<128x128xf32>
    %51 = arith.mulf %47, %50 : vector<128x128xf32>
    %52 = math.erf %51 : vector<128x128xf32>
    %cst_14 = arith.constant 1.000000e+00 : f32
    %53 = vector.broadcast %cst_14 : f32 to vector<128x128xf32>
    %54 = arith.addf %53, %52 : vector<128x128xf32>
    %55 = arith.mulf %49, %54 : vector<128x128xf32>
    %c0_15 = arith.constant 0 : index
    %c0_16 = arith.constant 0 : index
    %56 = vector.load %arg6[%c0_15, %c0_16] : memref<1x128xf32, #tpu.memory_space<vmem>>, vector<1x128xf32>
    %57 = vector.broadcast %56 : vector<1x128xf32> to vector<128x128xf32>
    %58 = arith.mulf %55, %57 : vector<128x128xf32>
    %cst_17 = arith.constant dense<0.000000e+00> : vector<128xf32>
    %59 = vector.multi_reduction <add>, %58, %cst_17 [1] : vector<128x128xf32> to vector<128xf32>
    %c0_18 = arith.constant 0 : index
    %60 = memref.load %arg7[%c0_18] : memref<1xf32, #tpu.memory_space<smem>>
    %61 = vector.broadcast %60 : f32 to vector<128xf32>
    %62 = arith.addf %59, %61 : vector<128xf32>
    %63 = vector.shape_cast %62 : vector<128xf32> to vector<1x128xf32>
    %c0_19 = arith.constant 0 : index
    %c0_20 = arith.constant 0 : index
    %64 = vector.load %arg8[%c0_19, %c0_20] : memref<1x128xf32, #tpu.memory_space<vmem>>, vector<1x128xf32>
    tpu.vector_store %arg8[%c0_19, %c0_20], %63 {strides = array<i32>} : memref<1x128xf32, #tpu.memory_space<vmem>>, vector<1x128xf32>,
    return
  }
  func.func @transform_0(%arg0: i32) -> (i32, i32) {
    %c0_i32 = arith.constant 0 : i32
    %c0_i32_0 = arith.constant 0 : i32
    return %arg0, %c0_i32 : i32, i32
  }
  func.func @transform_1(%arg0: i32) -> (i32, i32) {
    %c0_i32 = arith.constant 0 : i32
    %c0_i32_0 = arith.constant 0 : i32
    %c0_i32_1 = arith.constant 0 : i32
    return %c0_i32, %c0_i32_0 : i32, i32
  }
  func.func @transform_2(%arg0: i32) -> (i32, i32) {
    %c0_i32 = arith.constant 0 : i32
    %c0_i32_0 = arith.constant 0 : i32
    %c0_i32_1 = arith.constant 0 : i32
    return %c0_i32, %c0_i32_0 : i32, i32
  }
  func.func @transform_3(%arg0: i32) -> (i32, i32) {
    %c0_i32 = arith.constant 0 : i32
    %c0_i32_0 = arith.constant 0 : i32
    %c0_i32_1 = arith.constant 0 : i32
    return %c0_i32, %c0_i32_0 : i32, i32
  }
  func.func @transform_4(%arg0: i32) -> (i32, i32) {
    %c0_i32 = arith.constant 0 : i32
    %c0_i32_0 = arith.constant 0 : i32
    %c0_i32_1 = arith.constant 0 : i32
    return %c0_i32, %c0_i32_0 : i32, i32
  }
  func.func @transform_5(%arg0: i32) -> (i32, i32) {
    %c0_i32 = arith.constant 0 : i32
    %c0_i32_0 = arith.constant 0 : i32
    %c0_i32_1 = arith.constant 0 : i32
    return %c0_i32, %c0_i32_0 : i32, i32
  }
  func.func @transform_6(%arg0: i32) -> i32 {
    %c0_i32 = arith.constant 0 : i32
    %c0_i32_0 = arith.constant 0 : i32
    return %c0_i32 : i32
  }
  func.func @transform_7(%arg0: i32) -> (i32, i32) {
    %c0_i32 = arith.constant 0 : i32
    %c0_i32_0 = arith.constant 0 : i32
    return %c0_i32, %arg0 : i32, i32
  }
}

</mosaic_0001>

<bundles_post_ra>
// kernel: tpu_custom_call.1
= control target key start
LH: loop header
LB: loop body
LE: loop exit
PB: predicated region body
PF: predicated region fallthrough
CT: control target
= control target key end

     0   :  { %v1322_v2 = vmov 4   ;;  %v1323_v3 = vmov 1   ;;  %v1324_v7 = vmov 0   ;;  %s1943_s0 = inlined_call_operand.vmem [shape: f32[128,5], index: 0, kind: input, shape index: {}]   ;;  %s1944_s1 = inlined_call_operand.vmem [shape: f32[5,128], index: 1, kind: input, shape index: {}]   ;;  %s1945_s2 = inlined_call_operand.vmem [shape: f32[1,128], index: 2, kind: input, shape index: {}]   ;;  %s1946_s3 = inlined_call_operand.vmem [shape: bf16[128,128], index: 3, kind: input, shape index: {}]   ;;  %s1947_s4 = inlined_call_operand.vmem [shape: f32[1,128], index: 4, kind: input, shape index: {}]   ;;  %s1948_s5 = inlined_call_operand.vmem [shape: f32[1,128], index: 5, kind: input, shape index: {}]   ;;  %s1949_s6 = inlined_call_operand.<no memory space> [shape: f32[1], index: 6, kind: input, shape index: {}]   ;;  %s1950_s7 = inlined_call_operand.hbm [shape: f32[1,128], index: 7, kind: output, shape index: {}]  }
   0x1   :  { %v1371_v0 = vld [vmem:[%s1943_s0 + $0x8] sm:$0xff]  ;;  %v1376_v1 = vld [vmem:[%s1943_s0] sm:$0xff]  ;;  %1208 = vset.pattern.permute.xlu0 %v1322_v2  ;;  %1202 = vset.pattern.permute.xlu1 %v1323_v3  ;;  %v1397_v6 = vld [vmem:[%s1943_s0 + $0x18] sm:$0xff] }
   0x2   :  { %451 = vperm.xlu0 %1208, %v1371_v0   ;;  %147 = vperm.xlu1 %1202, %v1376_v1   ;;  %v1385_v4 = vld [vmem:[%s1943_s0 + $0x20] sm:$0xff]  ;;  %v1390_v5 = vld [vmem:[%s1943_s0 + $0x48] sm:$0xff] }
   0x6   :  { %463 = vperm.xlu0 %1208, %v1385_v4   ;;  %151 = vperm.xlu1 %1202, %v1371_v0  }
   0xa   :  { %483 = vperm.xlu0 %1208, %v1390_v5   ;;  %1203 = vset.pattern.permute.xlu1 %v1324_v7 }
   0xb   :  { %13 = vsyncpa [#allocation4], 0  ;;  %63 = vperm.xlu1 %1203, %v1397_v6   ;;  %v1405_v8 = vld [vmem:[%s1943_s0 + $0x38] sm:$0xff]  ;;  %v1325_v10 = vmov 2   ;;  %v31_v11 = vld [vmem:[%s1943_s0 + $0x10] sm:$0xff]  ;;  %v1326_v12 = vmov 3   ;;  %v126_v52 = vlaneseq }
   0xc   :  { %v1412_v9 = vld [vmem:[%s1943_s0 + $0x58] sm:$0xff]  ;;  %v1432_v13 = vld [vmem:[%s1943_s0 + $0x30] sm:$0xff]  ;;  %v1441_v14 = vld [vmem:[%s1943_s0 + $0x68] sm:$0xff]  ;;  %vm1005_vm0 = vcmask 130112   ;;  %vm1012_vm1 = vcmask 195712   ;;  %vm1019_vm2 = vcmask 261312  }
   0xd   :  { %v1448_v15 = vld [vmem:[%s1943_s0 + $0x70] sm:$0xff]  ;;  %v1453_v16 = vld [vmem:[%s1943_s0 + $0x28] sm:$0xff]  ;;  %v1461_v17 = vld [vmem:[%s1943_s0 + $0x40] sm:$0xff]  ;;  %v1607_v55 = vshrl.u32 %v126_v52, 7  ;;  %vm1026_vm3 = vcmask 326912   ;;  %vm1033_vm4 = vcmask 392512  }
   0xe   :  { %475 = vperm.xlu0 %1208, %v1405_v8   ;;  %v1479_v18 = vld [vmem:[%s1943_s0 + $0x50] sm:$0xff]  ;;  %v1228_v19 = vld [vmem:[%s1946_s3 + $0x38] sm:$0xff]   ;;  %v1230_v21 = vld [vmem:[%s1946_s3 + $0x28] sm:$0xff]   ;;  %vm1040_vm5 = vcmask 458112   ;;  %vm1047_vm6 = vcmask 523712   ;;  %vm1054_vm7 = vcmask 589312  }
   0xf   :  { %1204 = vset.pattern.permute.xlu1 %v1323_v3  ;;  %1148 = vmatprep.subr.bf16.mxu0 %v1228_v19  ;;  %v1229_v20 = vld [vmem:[%s1946_s3 + $0x30] sm:$0xff]   ;;  %v1231_v22 = vld [vmem:[%s1946_s3 + $0x20] sm:$0xff]   ;;  %v1232_v23 = vld [vmem:[%s1946_s3 + $0x18] sm:$0xff]   ;;  %v212_v58 = vsub.s32 1, %v1607_v55  ;;  %v128_v59 = vsub.s32 0, %v1607_v55  ;;  %vm1061_vm8 = vcmask 654912  }
  0x10   :  { %159 = vperm.xlu1 %1204, %v1397_v6   ;;  %1149 = vmatpush3.bf16.msra.mxu0 %v1228_v19  ;;  %v1233_v24 = vld [vmem:[%s1946_s3 + $0x10] sm:$0xff]   ;;  %v1526_v25 = vld [vmem:[%s1943_s0 + $0x60] sm:$0xff]  ;;  %v1234_v26 = vld [vmem:[%s1946_s3 + $0x8] sm:$0xff]   ;;  %vm1068_vm9 = vcmask 720512   ;;  %vm1075_vm10 = vcmask 786112   ;;  %vm1082_vm11 = vcmask 851712  }
  0x11   :  { %1180 = vmatprep.subr.bf16.mxu1 %v1228_v19  ;;  %1150 = vmatprep.subr.bf16.mxu0 %v1229_v20  ;;  %v1540_v29 = vld [vmem:[%s1943_s0 + $0x78] sm:$0xff]  ;;  %v1235_v30 = vld [vmem:[%s1946_s3] sm:$0xff]   ;;  %vm1089_vm12 = vcmask 917312   ;;  %vm1096_vm13 = vcmask 982912   ;;  %vm1103_vm14 = vcmask 1048512  }
  0x12   :  { %491 = vperm.xlu0 %1208, %v1412_v9   ;;  %1188 = vmatpush3.bf16.msra.mxu1 %v1228_v19  ;;  %v45_v60 = vld [vmem:[%s1944_s1] sm:$0x1f] }
  0x13   :  { %1181 = vmatprep.subr.bf16.mxu1 %v1229_v20  ;;  %v1619_v63 = vrot.slane %v45_v60, %v212_v58 }
  0x14   :  { %1205 = vset.pattern.permute.xlu1 %v1325_v10  ;;  %1151 = vmatpush3.bf16.msra.mxu0 %v1229_v20 }
  0x15   :  { %247 = vperm.xlu1 %1205, %v1376_v1   ;;  %1152 = vmatprep.subr.bf16.mxu0 %v1230_v21 }
  0x16   :  { %1216 = vset.pattern.permute.xlu0 %v1324_v7  ;;  %1189 = vmatpush3.bf16.msra.mxu1 %v1229_v20 }
  0x17   :  { %48 = vperm.xlu0 %1216, %v1376_v1   ;;  %1182 = vmatprep.subr.bf16.mxu1 %v1230_v21 }
  0x18   :  { %1153 = vmatpush3.bf16.msra.mxu0 %v1230_v21 }
  0x19   :  { %255 = vperm.xlu1 %1205, %v31_v11   ;;  %1154 = vmatprep.subr.bf16.mxu0 %v1231_v22 }
  0x1a   :  { %1190 = vmatpush3.bf16.msra.mxu1 %v1230_v21 }
  0x1b   :  { %53 = vperm.xlu0 %1216, %v1371_v0   ;;  %1183 = vmatprep.subr.bf16.mxu1 %v1231_v22 }
  0x1c   :  { %1155 = vmatpush3.bf16.msra.mxu0 %v1231_v22 }
  0x1d   :  { %259 = vperm.xlu1 %1205, %v1397_v6   ;;  %1156 = vmatprep.subr.bf16.mxu0 %v1232_v23 }
  0x1e   :  { %1191 = vmatpush3.bf16.msra.mxu1 %v1231_v22 }
  0x1f   :  { %58 = vperm.xlu0 %1216, %v31_v11   ;;  %1184 = vmatprep.subr.bf16.mxu1 %v1232_v23 }
  0x20   :  { %1157 = vmatpush3.bf16.msra.mxu0 %v1232_v23 }
  0x21   :  { %1206 = vset.pattern.permute.xlu1 %v1326_v12  ;;  %1158 = vmatprep.subr.bf16.mxu0 %v1233_v24 }
  0x22   :  { %351 = vperm.xlu1 %1206, %v1371_v0   ;;  %1192 = vmatpush3.bf16.msra.mxu1 %v1232_v23 }
  0x23   :  { %68 = vperm.xlu0 %1216, %v1385_v4   ;;  %1185 = vmatprep.subr.bf16.mxu1 %v1233_v24 }
  0x24   :  { %1159 = vmatpush3.bf16.msra.mxu0 %v1233_v24 }
  0x25   :  { %1160 = vmatprep.subr.bf16.mxu0 %v1234_v26 }
  0x26   :  { %355 = vperm.xlu1 %1206, %v31_v11   ;;  %1193 = vmatpush3.bf16.msra.mxu1 %v1233_v24 }
  0x27   :  { %93 = vperm.xlu0 %1216, %v1390_v5   ;;  %1186 = vmatprep.subr.bf16.mxu1 %v1234_v26 }
  0x28   :  { %1161 = vmatpush3.bf16.msra.mxu0 %v1234_v26 }
  0x29   :  { %1162 = vmatprep.subr.bf16.mxu0 %v1235_v30 }
  0x2a   :  { %1207 = vset.pattern.permute.xlu1 %v1322_v2  ;;  %1194 = vmatpush3.bf16.msra.mxu1 %v1234_v26 }
  0x2b   :  { %78 = vperm.xlu0 %1216, %v1432_v13   ;;  %447 = vperm.xlu1 %1207, %v1376_v1  }
  0x2c   :  { %1187 = vmatprep.subr.bf16.mxu1 %v1235_v30  ;;  %1163 = vmatpush3.bf16.msra.mxu0 %v1235_v30 }
  0x2e   :  { %1195 = vmatpush3.bf16.msra.mxu1 %v1235_v30 }
  0x2f   :  { %103 = vperm.xlu0 %1216, %v1412_v9   ;;  %455 = vperm.xlu1 %1207, %v31_v11  }
  0x33   :  { %113 = vperm.xlu0 %1216, %v1441_v14   ;;  %459 = vperm.xlu1 %1207, %v1397_v6  }
  0x37   :  { %118 = vperm.xlu0 %1216, %v1448_v15   ;;  %1209 = vset.pattern.permute.xlu1 %v1324_v7 }
  0x38   :  { %73 = vperm.xlu1 %1209, %v1453_v16  }
  0x3b   :  { %1219 = vset.pattern.permute.xlu0 %v1323_v3 }
  0x3c   :  { %155 = vperm.xlu0 %1219, %v31_v11   ;;  %88 = vperm.xlu1 %1209, %v1461_v17   ;;  %v412_v11 = vsub.s32 3, %v1607_v55 }
  0x3e   :  { %v1651_v21 = vrot.slane %v45_v60, %v412_v11 }
  0x40   :  { %167 = vperm.xlu0 %1219, %v1453_v16   ;;  %1210 = vset.pattern.permute.xlu1 %v1323_v3 }
  0x41   :  { %163 = vperm.xlu1 %1210, %v1385_v4  }
  0x44   :  { %175 = vperm.xlu0 %1219, %v1405_v8  }
  0x45   :  { %179 = vperm.xlu1 %1210, %v1461_v17  }
  0x48   :  { %203 = vperm.xlu0 %1219, %v1448_v15  }
  0x49   :  { %183 = vperm.xlu1 %1210, %v1390_v5  }
  0x4c   :  { %1221 = vset.pattern.permute.xlu0 %v1325_v10 }
  0x4d   :  { %251 = vperm.xlu0 %1221, %v1371_v0   ;;  %1211 = vset.pattern.permute.xlu1 %v1324_v7  ;;  %v1621_v0 = vrot.slane %v45_v60, %v128_v59 }
  0x4e   :  { %83 = vperm.xlu1 %1211, %v1405_v8  }
  0x51   :  { %263 = vperm.xlu0 %1221, %v1385_v4  }
  0x52   :  { %98 = vperm.xlu1 %1211, %v1479_v18  }
  0x55   :  { %283 = vperm.xlu0 %1221, %v1390_v5  }
  0x56   :  { %1212 = vset.pattern.permute.xlu1 %v1323_v3 }
  0x57   :  { %171 = vperm.xlu1 %1212, %v1432_v13  }
  0x59   :  { %275 = vperm.xlu0 %1221, %v1405_v8  }
  0x5b   :  { %187 = vperm.xlu1 %1212, %v1479_v18  }
  0x5d   :  { %291 = vperm.xlu0 %1221, %v1412_v9  }
  0x5f   :  { %191 = vperm.xlu1 %1212, %v1412_v9  }
  0x61   :  { %299 = vperm.xlu0 %1221, %v1441_v14  }
  0x63   :  { %1213 = vset.pattern.permute.xlu1 %v1325_v10 }
  0x64   :  { %267 = vperm.xlu1 %1213, %v1453_v16  }
  0x65   :  { %1224 = vset.pattern.permute.xlu0 %v1326_v12 }
  0x66   :  { %347 = vperm.xlu0 %1224, %v1376_v1  }
  0x68   :  { %279 = vperm.xlu1 %1213, %v1461_v17  }
  0x6a   :  { %359 = vperm.xlu0 %1224, %v1397_v6  }
  0x6c   :  { %271 = vperm.xlu1 %1213, %v1432_v13  }
  0x6e   :  { %367 = vperm.xlu0 %1224, %v1453_v16  }
  0x70   :  { %287 = vperm.xlu1 %1213, %v1479_v18  }
  0x72   :  { %371 = vperm.xlu0 %1224, %v1432_v13  }
  0x74   :  { %1214 = vset.pattern.permute.xlu1 %v1326_v12 }
  0x75   :  { %363 = vperm.xlu1 %1214, %v1385_v4  }
  0x76   :  { %387 = vperm.xlu0 %1224, %v1479_v18  }
  0x79   :  { %379 = vperm.xlu1 %1214, %v1461_v17  }
  0x7a   :  { %395 = vperm.xlu0 %1224, %v1526_v25  }
  0x7d   :  { %383 = vperm.xlu1 %1214, %v1390_v5   ;;  %v1533_v27 = vpop.permute.xlu1 %147  ;;  %v1535_v28 = vpop.permute.xlu0 %451 }
  0x7e   :  { %407 = vperm.xlu0 %1224, %v1540_v29   ;;  %v214_v11 = vmul.f32 %v1619_v63, %v1533_v27  ;;  %v1701_v27 = vld [vmem:[%s1945_s2] ss:$0 sm:$0xff] }
  0x81   :  { %375 = vperm.xlu1 %1214, %v1405_v8   ;;  %v1547_v31 = vpop.permute.xlu1 %151  ;;  %v1549_v32 = vpop.permute.xlu0 %463 }
  0x82   :  { %1227 = vset.pattern.permute.xlu0 %v1322_v2  ;;  %v215_v19 = vmul.f32 %v1619_v63, %v1547_v31 }
  0x83   :  { %499 = vperm.xlu0 %1227, %v1441_v14  }
  0x85   :  { %391 = vperm.xlu1 %1214, %v1412_v9   ;;  %v1554_v33 = vpop.permute.xlu0 %483 }
  0x86   :  { %v1556_v34 = vpop.permute.xlu1 %63 }
  0x89   :  { %1215 = vset.pattern.permute.xlu1 %v1322_v2  ;;  %v1559_v35 = vpop.permute.xlu0 %475 }
  0x8a   :  { %467 = vperm.xlu1 %1215, %v1453_v16  }
  0x8b   :  { %v1562_v36 = vpop.permute.xlu1 %159 }
  0x8d   :  { %v1564_v37 = vpop.permute.xlu0 %491 }
  0x8e   :  { %479 = vperm.xlu1 %1215, %v1461_v17  }
  0x90   :  { %v1567_v38 = vpop.permute.xlu1 %247 }
  0x92   :  { %v1569_v39 = vpop.permute.xlu0 %48  ;;  %471 = vperm.xlu1 %1215, %v1432_v13  }
  0x94   :  { %v1572_v40 = vpop.permute.xlu1 %255 }
  0x96   :  { %v54_v41 = vpop.permute.xlu0 %53  ;;  %487 = vperm.xlu1 %1215, %v1479_v18  }
  0x98   :  { %v1575_v42 = vpop.permute.xlu1 %259 }
  0x9a   :  { %1217 = vset.pattern.permute.xlu1 %v1324_v7  ;;  %v1578_v43 = vpop.permute.xlu0 %58 }
  0x9b   :  { %108 = vperm.xlu1 %1217, %v1526_v25  }
  0x9d   :  { %v352_v44 = vpop.permute.xlu1 %351 }
  0x9e   :  { %v1581_v45 = vpop.permute.xlu0 %68 }
  0x9f   :  { %1218 = vset.pattern.permute.xlu1 %v1323_v3 }
  0xa0   :  { %195 = vperm.xlu1 %1218, %v1526_v25  }
  0xa1   :  { %v1585_v46 = vpop.permute.xlu1 %355 }
  0xa2   :  { %v1587_v47 = vpop.permute.xlu0 %93 }
  0xa4   :  { %199 = vperm.xlu1 %1218, %v1441_v14  }
  0xa6   :  { %v1590_v48 = vpop.permute.xlu1 %447  ;;  %v1592_v49 = vpop.permute.xlu0 %78 }
  0xa8   :  { %1220 = vset.pattern.permute.xlu1 %v1324_v7 }
  0xa9   :  { %123 = vperm.xlu1 %1220, %v1540_v29  }
  0xaa   :  { %v1596_v50 = vpop.permute.xlu1 %455  ;;  %v1598_v51 = vpop.permute.xlu0 %103 }
  0xad   :  { %1222 = vset.pattern.permute.xlu1 %v1323_v3 }
  0xae   :  { %207 = vperm.xlu1 %1222, %v1540_v29   ;;  %v1602_v53 = vpop.permute.xlu1 %459  ;;  %v1604_v54 = vpop.permute.xlu0 %113 }
  0xb2   :  { %1223 = vset.pattern.permute.xlu1 %v1325_v10  ;;  %v119_v56 = vpop.permute.xlu0 %118  ;;  %v312_v10 = vsub.s32 2, %v1607_v55 }
  0xb3   :  { %295 = vperm.xlu1 %1223, %v1526_v25   ;;  %v74_v57 = vpop.permute.xlu1 %73  ;;  %v144_v9 = vmul.f32 %v1621_v0, %v119_v56 }
  0xb4   :  { %v135_v3 = vmul.f32 %v1621_v0, %v74_v57  ;;  %v1649_v20 = vrot.slane %v45_v60, %v312_v10 }
  0xb7   :  { %v156_v61 = vpop.permute.xlu0 %155  ;;  %303 = vperm.xlu1 %1223, %v1448_v15   ;;  %v1617_v62 = vpop.permute.xlu1 %88 }
  0xbb   :  { %v168_v1 = vpop.permute.xlu0 %167  ;;  %307 = vperm.xlu1 %1223, %v1540_v29  }
  0xbc   :  { %v219_v4 = vmul.f32 %v1619_v63, %v168_v1  ;;  %v1626_v5 = vpop.permute.xlu1 %163  ;;  %v216_v1 = vmul.f32 %v1619_v63, %v156_v61  ;;  %v416_v61 = vmul.f32 %v1651_v21, %v1585_v46 }
  0xbe   :  { %v1628_v6 = vadd.f32 %v219_v4, %v135_v3 }
  0xbf   :  { %1225 = vset.pattern.permute.xlu1 %v1326_v12  ;;  %v1631_v7 = vpop.permute.xlu0 %175  ;;  %v131_v12 = vmul.f32 %v1621_v0, %v54_v41  ;;  %v415_v41 = vmul.f32 %v1651_v21, %v352_v44 }
  0xc0   :  { %399 = vperm.xlu1 %1225, %v1441_v14   ;;  %v1634_v8 = vpop.permute.xlu1 %179  ;;  %v512_v14 = vsub.s32 4, %v1607_v55 }
  0xc1   :  { %v231_v23 = vadd.f32 %v215_v19, %v131_v12  ;;  %v217_v19 = vmul.f32 %v1619_v63, %v1562_v36 }
  0xc2   :  { %v1658_v30 = vrot.slane %v45_v60, %v512_v14 }
  0xc3   :  { %v204_v13 = vpop.permute.xlu0 %203 }
  0xc4   :  { %v228_v16 = vmul.f32 %v1619_v63, %v204_v13  ;;  %403 = vperm.xlu1 %1225, %v1448_v15   ;;  %v1641_v17 = vpop.permute.xlu1 %183  ;;  %v515_v57 = vmul.f32 %v1658_v30, %v1535_v28 }
  0xc6   :  { %v1644_v18 = vadd.f32 %v228_v16, %v144_v9 }
  0xc8   :  { %v252_v22 = vpop.permute.xlu0 %251  ;;  %1226 = vset.pattern.permute.xlu1 %v1322_v2 }
  0xc9   :  { %v315_v24 = vmul.f32 %v1649_v20, %v252_v22  ;;  %495 = vperm.xlu1 %1226, %v1526_v25   ;;  %v1656_v26 = vpop.permute.xlu1 %83  ;;  %v132_v25 = vmul.f32 %v1621_v0, %v1578_v43  ;;  %v130_v43 = vmul.f32 %v1621_v0, %v1569_v39  ;;  %v314_v39 = vmul.f32 %v1649_v20, %v1567_v38 }
  0xcb   :  { %v331_v56 = vadd.f32 %v315_v24, %v231_v23  ;;  %v232_v3 = vadd.f32 %v216_v1, %v132_v25  ;;  %v230_v12 = vadd.f32 %v214_v11, %v130_v43  ;;  %v317_v24 = vmul.f32 %v1649_v20, %v1575_v42 }
  0xcc   :  { %v264_v31 = vpop.permute.xlu0 %263 }
  0xcd   :  { %v431_v58 = vadd.f32 %v415_v41, %v331_v56  ;;  %503 = vperm.xlu1 %1226, %v1448_v15   ;;  %v1664_v2 = vpop.permute.xlu1 %98  ;;  %v316_v15 = vmul.f32 %v1649_v20, %v1572_v40  ;;  %v516_v40 = vmul.f32 %v1658_v30, %v1596_v50  ;;  %v133_v50 = vmul.f32 %v1621_v0, %v1556_v34 }
  0xce   :  { %v330_v41 = vadd.f32 %v314_v39, %v230_v12  ;;  %v218_v12 = vmul.f32 %v1619_v63, %v1626_v5  ;;  %v139_v5 = vmul.f32 %v1621_v0, %v1587_v47  ;;  %v141_v47 = vmul.f32 %v1621_v0, %v1598_v51 }
  0xcf   :  { %v531_v59 = vadd.f32 %v515_v57, %v431_v58  ;;  %v332_v9 = vadd.f32 %v316_v15, %v232_v3  ;;  %v233_v38 = vadd.f32 %v217_v19, %v133_v50  ;;  %v514_v57 = vmul.f32 %v1658_v30, %v1590_v48 }
  0xd0   :  { %v1669_v60 = vpop.permute.xlu0 %283 }
  0xd1   :  { %507 = vperm.xlu1 %1226, %v1540_v29   ;;  %v432_v13 = vadd.f32 %v416_v61, %v332_v9  ;;  %v554_v23 = vadd.f32 %v1701_v27, %v531_v59  ;;  %v333_v3 = vadd.f32 %v317_v24, %v233_v38  ;;  %v517_v9 = vmul.f32 %v1658_v30, %v1602_v53 }
  0xd2   :  { %v1672_v44 = vpop.permute.xlu1 %171  ;;  %v318_v53 = vmul.f32 %v1649_v20, %v264_v31  ;;  %v323_v31 = vmul.f32 %v1649_v20, %v1669_v60 }
  0xd3   :  { %v532_v46 = vadd.f32 %v516_v40, %v432_v13  ;;  %v586_v1 = vmul.f32 0.70710677, %v554_v23  ;;  %v134_v13 = vmul.f32 %v1621_v0, %v1581_v45  ;;  %v518_v45 = vmul.f32 %v1658_v30, %v1549_v32 }
  0xd4   :  { %v1674_v4 = vpop.permute.xlu0 %275  ;;  %v137_v32 = vmul.f32 %v1621_v0, %v1656_v26 }
  0xd5   :  { %v1714_v25 = vadd.f32 %v1701_v27, %v532_v46  ;;  %1236 = verf.f32 %v586_v1  ;;  %v221_v1 = vmul.f32 %v1619_v63, %v1631_v7  ;;  %v523_v7 = vmul.f32 %v1658_v30, %v1554_v33 }
  0xd6   :  { %v1678_v28 = vpop.permute.xlu1 %187 }
  0xd7   :  { %v587_v48 = vmul.f32 0.70710677, %v1714_v25  ;;  %v237_v26 = vadd.f32 %v221_v1, %v137_v32  ;;  %v571_v33 = vmul.f32 0.5, %v1714_v25 }
  0xd8   :  { %v1680_v10 = vpop.permute.xlu0 %291 }
  0xd9   :  { %1238 = verf.f32 %v587_v48 }
  0xda   :  { %v192_v29 = vpop.permute.xlu1 %191 }
  0xdc   :  { %v1688_v16 = vpop.permute.xlu0 %299 }
  0xdf   :  { %v1692_v14 = vpop.permute.xlu1 %267 }
  0xe1   :  { %v348_v22 = vpop.permute.xlu0 %347 }
  0xe2   :  { %v414_v36 = vmul.f32 %v1651_v21, %v348_v22  ;;  %v234_v22 = vadd.f32 %v218_v12, %v134_v13 }
  0xe3   :  { %v1709_v56 = vpop.permute.xlu1 %279 }
  0xe4   :  { %v430_v58 = vadd.f32 %v414_v36, %v330_v41  ;;  %v334_v24 = vadd.f32 %v318_v53, %v234_v22  ;;  %v223_v36 = vmul.f32 %v1619_v63, %v1641_v17  ;;  %v321_v17 = vmul.f32 %v1649_v20, %v1674_v4 }
  0xe5   :  { %v360_v59 = vpop.permute.xlu0 %359  ;;  %v325_v4 = vmul.f32 %v1649_v20, %v1680_v10  ;;  %v319_v10 = vmul.f32 %v1649_v20, %v1692_v14  ;;  %v525_v14 = vmul.f32 %v1658_v30, %v1564_v37 }
  0xe6   :  { %v530_v34 = vadd.f32 %v514_v57, %v430_v58  ;;  %v417_v15 = vmul.f32 %v1651_v21, %v360_v59  ;;  %v1237_v59 = vpop.eup %1236  ;;  %v337_v53 = vadd.f32 %v321_v17, %v237_v26 }
  0xe7   :  { %v1717_v42 = vpop.permute.xlu1 %271  ;;  %v618_v48 = vadd.f32 1.0, %v1237_v59 }
  0xe8   :  { %v433_v43 = vadd.f32 %v417_v15, %v333_v3  ;;  %v553_v61 = vadd.f32 %v1701_v27, %v530_v34  ;;  %v239_v3 = vadd.f32 %v223_v36, %v139_v5  ;;  %v225_v34 = vmul.f32 %v1619_v63, %v192_v29 }
  0xea   :  { %v533_v11 = vadd.f32 %v517_v9, %v433_v43  ;;  %v585_v19 = vmul.f32 0.70710677, %v553_v61  ;;  %v1239_v9 = vpop.eup %1238  ;;  %v339_v60 = vadd.f32 %v323_v31, %v239_v3  ;;  %v569_v12 = vmul.f32 0.5, %v553_v61  ;;  %v368_v61 = vpop.permute.xlu0 %367 }
  0xeb   :  { %v1727_v40 = vpop.permute.xlu1 %287  ;;  %v241_v29 = vadd.f32 %v225_v34, %v141_v47  ;;  %v619_v22 = vadd.f32 1.0, %v1239_v9  ;;  %v222_v47 = vmul.f32 %v1619_v63, %v1634_v8  ;;  %v419_v34 = vmul.f32 %v1651_v21, %v368_v61 }
  0xec   :  { %v556_v39 = vadd.f32 %v1701_v27, %v533_v11  ;;  %1240 = verf.f32 %v585_v19  ;;  %v570_v19 = vmul.f32 0.5, %v554_v23  ;;  %v521_v23 = vmul.f32 %v1658_v30, %v1559_v35 }
  0xed   :  { %v635_v32 = vmul.f32 %v619_v22, %v571_v33  ;;  %v341_v25 = vadd.f32 %v325_v4, %v241_v29  ;;  %v138_v9 = vmul.f32 %v1621_v0, %v1617_v62  ;;  %v136_v8 = vmul.f32 %v1621_v0, %v1592_v49 }
  0xee   :  { %v588_v46 = vmul.f32 0.70710677, %v556_v39  ;;  %v634_v5 = vmul.f32 %v618_v48, %v570_v19  ;;  %v572_v36 = vmul.f32 0.5, %v556_v39  ;;  %v322_v48 = vmul.f32 %v1649_v20, %v1709_v56 }
  0xef   :  { %v320_v56 = vmul.f32 %v1649_v20, %v1717_v42  ;;  %v224_v19 = vmul.f32 %v1619_v63, %v1678_v28 }
  0xf0   :  { %1242 = verf.f32 %v588_v46  ;;  %v364_v50 = vpop.permute.xlu1 %363 }
  0xf1   :  { %v418_v41 = vmul.f32 %v1651_v21, %v364_v50 }
  0xf3   :  { %v434_v38 = vadd.f32 %v418_v41, %v334_v24 }
  0xf4   :  { %v1738_v57 = vpop.permute.xlu1 %379 }
  0xf5   :  { %v534_v58 = vadd.f32 %v518_v45, %v434_v38  ;;  %v422_v49 = vmul.f32 %v1651_v21, %v1738_v57 }
  0xf7   :  { %v1767_v35 = vadd.f32 %v1701_v27, %v534_v58  ;;  %v220_v58 = vmul.f32 %v1619_v63, %v1672_v44  ;;  %v140_v44 = vmul.f32 %v1621_v0, %v1664_v2 }
  0xf8   :  { %v384_v15 = vpop.permute.xlu1 %383 }
  0xf9   :  { %v423_v43 = vmul.f32 %v1651_v21, %v384_v15  ;;  %v1241_v11 = vpop.eup %1240  ;;  %v236_v4 = vadd.f32 %v220_v58, %v136_v8  ;;  %v240_v28 = vadd.f32 %v224_v19, %v140_v44  ;;  %v143_v44 = vmul.f32 %v1621_v0, %v1604_v54 }
  0xfa   :  { %v617_v51 = vadd.f32 1.0, %v1241_v11  ;;  %v238_v11 = vadd.f32 %v222_v47, %v138_v9 }
  0xfb   :  { %v439_v13 = vadd.f32 %v423_v43, %v339_v60  ;;  %v335_v43 = vadd.f32 %v319_v10, %v1628_v6 }
  0xfc   :  { %v376_v46 = vpop.permute.xlu1 %375  ;;  %v633_v45 = vmul.f32 %v617_v51, %v569_v12  ;;  %v589_v12 = vmul.f32 0.70710677, %v1767_v35  ;;  %v338_v51 = vadd.f32 %v322_v48, %v238_v11 }
  0xfd   :  { %v1243_v50 = vpop.eup %1242  ;;  %v539_v24 = vadd.f32 %v523_v7, %v439_v13  ;;  %v421_v41 = vmul.f32 %v1651_v21, %v376_v46  ;;  %v372_v7 = vpop.permute.xlu0 %371  ;;  %v435_v62 = vadd.f32 %v419_v34, %v335_v43 }
  0xfe   :  { %v620_v38 = vadd.f32 1.0, %v1243_v50  ;;  %v649_v59 = vpack.c.bf16 %v634_v5, %v633_v45  ;;  %v420_v29 = vmul.f32 %v1651_v21, %v372_v7  ;;  %1244 = verf.f32 %v589_v12 }
  0xff   :  { %v437_v31 = vadd.f32 %v421_v41, %v337_v53  ;;  %v1781_v13 = vadd.f32 %v1701_v27, %v539_v24  ;;  %v438_v50 = vadd.f32 %v422_v49, %v338_v51  ;;  %v336_v24 = vadd.f32 %v320_v56, %v236_v4 }
 0x100   :  { %v392_v1 = vpop.permute.xlu1 %391  ;;  %v636_v3 = vmul.f32 %v620_v38, %v572_v36  ;;  %1164 = vmatprep.mubr.bf16.mxu0 %v649_v59  ;;  %v324_v45 = vmul.f32 %v1649_v20, %v1727_v40 }
 0x101   :  { %v537_v17 = vadd.f32 %v521_v23, %v437_v31  ;;  %v425_v39 = vmul.f32 %v1651_v21, %v392_v1  ;;  %v594_v22 = vmul.f32 0.70710677, %v1781_v13  ;;  %v388_v41 = vpop.permute.xlu0 %387  ;;  %v436_v36 = vadd.f32 %v420_v29, %v336_v24 }
 0x102   :  { %v650_v15 = vpack.c.bf16 %v636_v3, %v635_v32  ;;  %v424_v31 = vmul.f32 %v1651_v21, %v388_v41  ;;  %v340_v1 = vadd.f32 %v324_v45, %v240_v28  ;;  %v578_v51 = vmul.f32 0.5, %v1781_v13 }
 0x103   :  { %v441_v60 = vadd.f32 %v425_v39, %v341_v25  ;;  %v1795_v46 = vadd.f32 %v1701_v27, %v537_v17  ;;  %1246 = verf.f32 %v594_v22 }
 0x104   :  { %1165 = vmatmul.mubr.bf16.vlgmr.msra.gmra.mxu0 %v650_v15  ;;  %v440_v17 = vadd.f32 %v424_v31, %v340_v1 }
 0x105   :  { %v541_v26 = vadd.f32 %v525_v14, %v441_v60  ;;  %v468_v37 = vpop.permute.xlu1 %467  ;;  %v592_v38 = vmul.f32 0.70710677, %v1795_v46  ;;  %v576_v54 = vmul.f32 0.5, %v1795_v46 }
 0x106   :  { %v519_v6 = vmul.f32 %v1658_v30, %v468_v37 }
 0x107   :  { %v1804_v23 = vadd.f32 %v1701_v27, %v541_v26  ;;  %v573_v26 = vmul.f32 0.5, %v1767_v35  ;;  %v327_v35 = vmul.f32 %v1649_v20, %v1688_v16 }
 0x108   :  { %v535_v53 = vadd.f32 %v519_v6, %v435_v62 }
 0x109   :  { %v480_v57 = vpop.permute.xlu1 %479  ;;  %v596_v3 = vmul.f32 0.70710677, %v1804_v23 }
 0x10a   :  { %v558_v42 = vadd.f32 %v1701_v27, %v535_v53  ;;  %v522_v2 = vmul.f32 %v1658_v30, %v480_v57 }
 0x10b   :  { %v1245_v60 = vpop.eup %1244 }
 0x10c   :  { %v590_v5 = vmul.f32 0.70710677, %v558_v42  ;;  %v538_v33 = vadd.f32 %v522_v2, %v438_v50  ;;  %v621_v48 = vadd.f32 1.0, %v1245_v60  ;;  %v574_v7 = vmul.f32 0.5, %v558_v42 }
 0x10d   :  { %v472_v61 = vpop.permute.xlu1 %471 }
 0x10e   :  { %1248 = verf.f32 %v590_v5  ;;  %v561_v59 = vadd.f32 %v1701_v27, %v538_v33  ;;  %v520_v10 = vmul.f32 %v1658_v30, %v472_v61  ;;  %v637_v12 = vmul.f32 %v621_v48, %v573_v26 }
 0x10f   :  { %1250 = verf.f32 %v592_v38 }
 0x110   :  { %v593_v32 = vmul.f32 0.70710677, %v561_v59  ;;  %v536_v40 = vadd.f32 %v520_v10, %v436_v36  ;;  %v1247_v43 = vpop.eup %1246  ;;  %v577_v29 = vmul.f32 0.5, %v561_v59  ;;  %v580_v10 = vmul.f32 0.5, %v1804_v23 }
 0x111   :  { %v488_v47 = vpop.permute.xlu1 %487  ;;  %v626_v6 = vadd.f32 1.0, %v1247_v43 }
 0x112   :  { %1252 = verf.f32 %v593_v32  ;;  %v559_v25 = vadd.f32 %v1701_v27, %v536_v40  ;;  %v524_v39 = vmul.f32 %v1658_v30, %v488_v47 }
 0x113   :  { %1254 = verf.f32 %v596_v3  ;;  %v642_v2 = vmul.f32 %v626_v6, %v578_v51 }
 0x114   :  { %v591_v34 = vmul.f32 0.70710677, %v559_v25  ;;  %v540_v15 = vadd.f32 %v524_v39, %v440_v17  ;;  %v575_v28 = vmul.f32 0.5, %v559_v25  ;;  %v396_v17 = vpop.permute.xlu0 %395 }
 0x116   :  { %1256 = verf.f32 %v591_v34  ;;  %v563_v14 = vadd.f32 %v1701_v27, %v540_v15  ;;  %v109_v9 = vpop.permute.xlu1 %108 }
 0x117   :  { %v142_v43 = vmul.f32 %v1621_v0, %v109_v9 }
 0x118   :  { %v595_v8 = vmul.f32 0.70710677, %v563_v14  ;;  %v579_v16 = vmul.f32 0.5, %v563_v14  ;;  %v408_v39 = vpop.permute.xlu0 %407 }
 0x11a   :  { %1258 = verf.f32 %v595_v8 }
 0x11b   :  { %v1249_v11 = vpop.eup %1248  ;;  %v196_v58 = vpop.permute.xlu1 %195 }
 0x11c   :  { %v622_v37 = vadd.f32 1.0, %v1249_v11  ;;  %v1251_v62 = vpop.eup %1250  ;;  %v500_v15 = vpop.permute.xlu0 %499  ;;  %v226_v60 = vmul.f32 %v1619_v63, %v196_v58  ;;  %v426_v58 = vmul.f32 %v1651_v21, %v396_v17 }
 0x11d   :  { %v624_v24 = vadd.f32 1.0, %v1251_v62  ;;  %v527_v23 = vmul.f32 %v1658_v30, %v500_v15 }
 0x11e   :  { %v638_v49 = vmul.f32 %v622_v37, %v574_v7  ;;  %v242_v7 = vadd.f32 %v226_v60, %v142_v43 }
 0x11f   :  { %v1253_v56 = vpop.eup %1252  ;;  %v200_v19 = vpop.permute.xlu1 %199  ;;  %v640_v38 = vmul.f32 %v624_v24, %v576_v54 }
 0x120   :  { %v227_v53 = vmul.f32 %v1619_v63, %v200_v19  ;;  %v651_v4 = vpack.c.bf16 %v638_v49, %v637_v12  ;;  %v625_v57 = vadd.f32 1.0, %v1253_v56  ;;  %v1255_v22 = vpop.eup %1254 }
 0x121   :  { %v628_v61 = vadd.f32 1.0, %v1255_v22 }
 0x122   :  { %v243_v50 = vadd.f32 %v227_v53, %v143_v44  ;;  %1168 = vmatprep.mubr.bf16.mxu0 %v651_v4  ;;  %v641_v42 = vmul.f32 %v625_v57, %v577_v29 }
 0x123   :  { %v1257_v41 = vpop.eup %1256  ;;  %v644_v3 = vmul.f32 %v628_v61, %v580_v10 }
 0x124   :  { %v124_v45 = vpop.permute.xlu1 %123  ;;  %v653_v13 = vpack.c.bf16 %v642_v2, %v641_v42  ;;  %v623_v5 = vadd.f32 1.0, %v1257_v41  ;;  %v343_v33 = vadd.f32 %v327_v35, %v243_v50 }
 0x125   :  { %v145_v56 = vmul.f32 %v1621_v0, %v124_v45 }
 0x126   :  { %1172 = vmatprep.mubr.bf16.mxu1 %v653_v13  ;;  %v639_v36 = vmul.f32 %v623_v5, %v575_v28 }
 0x127   :  { %v1259_v31 = vpop.eup %1258 }
 0x128   :  { %v652_v59 = vpack.c.bf16 %v640_v38, %v639_v36  ;;  %v627_v1 = vadd.f32 1.0, %v1259_v31 }
 0x129   :  { %v208_v32 = vpop.permute.xlu1 %207 }
 0x12a   :  { %1169 = vmatmul.mubr.bf16.gmra.mxu0 %v652_v59  ;;  %v643_v40 = vmul.f32 %v627_v1, %v579_v16  ;;  %v229_v12 = vmul.f32 %v1619_v63, %v208_v32 }
 0x12c   :  { %v654_v46 = vpack.c.bf16 %v644_v3, %v643_v40  ;;  %v245_v29 = vadd.f32 %v229_v12, %v145_v56  ;;  %v1853_v12 = vld [vmem:[%s1948_s5] ss:$0 sm:$0xff] }
 0x12e   :  { %1173 = vmatmul.mubr.bf16.vlgmr.msra.gmra.mxu1 %v654_v46  ;;  %v296_v47 = vpop.permute.xlu1 %295 }
 0x12f   :  { %v326_v48 = vmul.f32 %v1649_v20, %v296_v47 }
 0x131   :  { %v342_v62 = vadd.f32 %v326_v48, %v242_v7 }
 0x132   :  { %v304_v25 = vpop.permute.xlu1 %303 }
 0x133   :  { %v328_v6 = vmul.f32 %v1649_v20, %v304_v25  ;;  %v442_v53 = vadd.f32 %v426_v58, %v342_v62 }
 0x135   :  { %v344_v63 = vadd.f32 %v328_v6, %v1644_v18 }
 0x136   :  { %v308_v34 = vpop.permute.xlu1 %307 }
 0x137   :  { %v329_v44 = vmul.f32 %v1649_v20, %v308_v34  ;;  %v429_v20 = vmul.f32 %v1651_v21, %v408_v39  ;;  %v1845_v39 = vld [vmem:[%s1947_s4] ss:$0 sm:$0xff] }
 0x139   :  { %v345_v35 = vadd.f32 %v329_v44, %v245_v29 }
 0x13b   :  { %v400_v8 = vpop.permute.xlu1 %399  ;;  %v445_v28 = vadd.f32 %v429_v20, %v345_v35 }
 0x13c   :  { %v427_v14 = vmul.f32 %v1651_v21, %v400_v8 }
 0x13e   :  { %v443_v11 = vadd.f32 %v427_v14, %v343_v33 }
 0x13f   :  { %v404_v26 = vpop.permute.xlu1 %403 }
 0x140   :  { %v543_v37 = vadd.f32 %v527_v23, %v443_v11  ;;  %v428_v51 = vmul.f32 %v1651_v21, %v404_v26 }
 0x142   :  { %v566_v49 = vadd.f32 %v1701_v27, %v543_v37  ;;  %v444_v50 = vadd.f32 %v428_v51, %v344_v63 }
 0x144   :  { %v496_v9 = vpop.permute.xlu1 %495  ;;  %v598_v19 = vmul.f32 0.70710677, %v566_v49  ;;  %v582_v21 = vmul.f32 0.5, %v566_v49 }
 0x145   :  { %v526_v4 = vmul.f32 %v1658_v30, %v496_v9 }
 0x146   :  { %1260 = verf.f32 %v598_v19 }
 0x147   :  { %v542_v57 = vadd.f32 %v526_v4, %v442_v53 }
 0x148   :  { %v504_v22 = vpop.permute.xlu1 %503 }
 0x149   :  { %v565_v42 = vadd.f32 %v1701_v27, %v542_v57  ;;  %v528_v0 = vmul.f32 %v1658_v30, %v504_v22 }
 0x14b   :  { %v597_v2 = vmul.f32 0.70710677, %v565_v42  ;;  %v544_v24 = vadd.f32 %v528_v0, %v444_v50  ;;  %v581_v31 = vmul.f32 0.5, %v565_v42 }
 0x14c   :  { %v508_v41 = vpop.permute.xlu1 %507 }
 0x14d   :  { %1262 = verf.f32 %v597_v2  ;;  %v567_v54 = vadd.f32 %v1701_v27, %v544_v24  ;;  %v529_v18 = vmul.f32 %v1658_v30, %v508_v41 }
 0x14f   :  { %v599_v45 = vmul.f32 0.70710677, %v567_v54  ;;  %v545_v13 = vadd.f32 %v529_v18, %v445_v28  ;;  %v583_v3 = vmul.f32 0.5, %v567_v54 }
 0x151   :  { %1264 = verf.f32 %v599_v45  ;;  %v568_v5 = vadd.f32 %v1701_v27, %v545_v13 }
 0x153   :  { %v600_v33 = vmul.f32 0.70710677, %v568_v5  ;;  %v1261_v36 = vpop.eup %1260  ;;  %v584_v46 = vmul.f32 0.5, %v568_v5 }
 0x154   :  { %v630_v38 = vadd.f32 1.0, %v1261_v36 }
 0x155   :  { %1266 = verf.f32 %v600_v33 }
 0x156   :  { %v646_v10 = vmul.f32 %v630_v38, %v582_v21 }
 0x15a   :  { %v1263_v61 = vpop.eup %1262 }
 0x15b   :  { %v629_v16 = vadd.f32 1.0, %v1263_v61 }
 0x15d   :  { %v645_v59 = vmul.f32 %v629_v16, %v581_v31 }
 0x15e   :  { %v1265_v1 = vpop.eup %1264 }
 0x15f   :  { %v655_v32 = vpack.c.bf16 %v646_v10, %v645_v59  ;;  %v631_v40 = vadd.f32 1.0, %v1265_v1 }
 0x161   :  { %1176 = vmatprep.mubr.bf16.mxu1 %v655_v32  ;;  %v647_v17 = vmul.f32 %v631_v40, %v583_v3 }
 0x162   :  { %v1267_v30 = vpop.eup %1266 }
 0x163   :  { %v632_v47 = vadd.f32 1.0, %v1267_v30 }
 0x165   :  { %v648_v27 = vmul.f32 %v632_v47, %v584_v46 }
 0x167   :  { %v656_v25 = vpack.c.bf16 %v648_v27, %v647_v17 }
 0x169   :  { %1177 = vmatmul.mubr.bf16.gmra.mxu1 %v656_v25 }
 0x1c4   :  { %v1166_v34 = vpop.f32.mrf.mxu0 }
 0x1c5   :  { %v771_v15 = vadd.f32 %v1166_v34, %v1845_v39 }
 0x1c6   :  { %v762_v60 = vpop.f32.mrf.mxu0 }
 0x1c7   :  { %v843_v8 = vmul.f32 0.70710677, %v771_v15  ;;  %v763_v14 = vadd.f32 %v1845_v39, %v762_v60  ;;  %v827_v26 = vmul.f32 0.5, %v771_v15 }
 0x1c8   :  { %v1167_v23 = vpop.f32.mrf.mxu0 }
 0x1c9   :  { %1268 = verf.f32 %v843_v8  ;;  %v841_v43 = vmul.f32 0.70710677, %v763_v14  ;;  %v774_v48 = vadd.f32 %v1167_v23, %v1845_v39  ;;  %v825_v49 = vmul.f32 0.5, %v763_v14 }
 0x1ca   :  { %v765_v63 = vpop.f32.mrf.mxu0 }
 0x1cb   :  { %1270 = verf.f32 %v841_v43  ;;  %v844_v11 = vmul.f32 0.70710677, %v774_v48  ;;  %v828_v51 = vmul.f32 0.5, %v774_v48  ;;  %v766_v35 = vadd.f32 %v1845_v39, %v765_v63 }
 0x1cd   :  { %1272 = verf.f32 %v844_v11  ;;  %v842_v20 = vmul.f32 0.70710677, %v766_v35  ;;  %v826_v25 = vmul.f32 0.5, %v766_v35 }
 0x1cf   :  { %1274 = verf.f32 %v842_v20 }
 0x1d6   :  { %v1269_v7 = vpop.eup %1268 }
 0x1d7   :  { %v875_v37 = vadd.f32 1.0, %v1269_v7 }
 0x1d8   :  { %v1271_v62 = vpop.eup %1270 }
 0x1d9   :  { %v891_v58 = vmul.f32 %v875_v37, %v827_v26  ;;  %v873_v6 = vadd.f32 1.0, %v1271_v62 }
 0x1da   :  { %v1273_v56 = vpop.eup %1272 }
 0x1db   :  { %v914_v44 = vmul.f32 %v1853_v12, %v891_v58  ;;  %v889_v9 = vmul.f32 %v873_v6, %v825_v49  ;;  %v876_v19 = vadd.f32 1.0, %v1273_v56 }
 0x1dc   :  { %v1275_v32 = vpop.eup %1274 }
 0x1dd   :  { %932 = vadd.xlane.f32.xlu0 %v914_v44  ;;  %v912_v53 = vmul.f32 %v1853_v12, %v889_v9  ;;  %v892_v4 = vmul.f32 %v876_v19, %v828_v51  ;;  %v874_v3 = vadd.f32 1.0, %v1275_v32 }
 0x1df   :  { %v915_v29 = vmul.f32 %v1853_v12, %v892_v4  ;;  %v890_v23 = vmul.f32 %v874_v3, %v826_v25 }
 0x1e1   :  { %928 = vadd.xlane.f32.xlu0 %v912_v53  ;;  %v913_v9 = vmul.f32 %v1853_v12, %v890_v23 }
 0x1e5   :  { %934 = vadd.xlane.f32.xlu0 %v915_v29 }
 0x1ea   :  { %v1170_v57 = vpop.f32.mrf.mxu0 }
 0x1eb   :  { %v787_v2 = vadd.f32 %v1170_v57, %v1845_v39 }
 0x1ec   :  { %v778_v22 = vpop.f32.mrf.mxu0 }
 0x1ed   :  { %v847_v13 = vmul.f32 0.70710677, %v787_v2  ;;  %v779_v5 = vadd.f32 %v1845_v39, %v778_v22  ;;  %v831_v37 = vmul.f32 0.5, %v787_v2 }
 0x1ee   :  { %v1171_v50 = vpop.f32.mrf.mxu0  ;;  %v1174_v42 = vpop.f32.mrf.mxu1 }
 0x1ef   :  { %v790_v0 = vadd.f32 %v1171_v50, %v1845_v39  ;;  %v845_v16 = vmul.f32 0.70710677, %v779_v5  ;;  %v803_v59 = vadd.f32 %v1174_v42, %v1845_v39  ;;  %v829_v53 = vmul.f32 0.5, %v779_v5 }
 0x1f0   :  { %v781_v24 = vpop.f32.mrf.mxu0  ;;  %v794_v41 = vpop.f32.mrf.mxu1 }
 0x1f1   :  { %v795_v54 = vadd.f32 %v1845_v39, %v794_v41  ;;  %v848_v18 = vmul.f32 0.70710677, %v790_v0  ;;  %v782_v45 = vadd.f32 %v1845_v39, %v781_v24  ;;  %v851_v1 = vmul.f32 0.70710677, %v803_v59 }
 0x1f2   :  { %v1175_v28 = vpop.f32.mrf.mxu1  ;;  %v832_v7 = vmul.f32 0.5, %v790_v0  ;;  %v835_v42 = vmul.f32 0.5, %v803_v59 }
 0x1f3   :  { %v849_v33 = vmul.f32 0.70710677, %v795_v54  ;;  %v846_v61 = vmul.f32 0.70710677, %v782_v45  ;;  %v806_v21 = vadd.f32 %v1175_v28, %v1845_v39  ;;  %v833_v46 = vmul.f32 0.5, %v795_v54 }
 0x1f4   :  { %v797_v36 = vpop.f32.mrf.mxu1  ;;  %v830_v51 = vmul.f32 0.5, %v782_v45 }
 0x1f5   :  { %v798_v38 = vadd.f32 %v1845_v39, %v797_v36  ;;  %1276 = verf.f32 %v849_v33  ;;  %v852_v10 = vmul.f32 0.70710677, %v806_v21  ;;  %v836_v50 = vmul.f32 0.5, %v806_v21 }
 0x1f6   :  { %1278 = verf.f32 %v848_v18 }
 0x1f7   :  { %v850_v31 = vmul.f32 0.70710677, %v798_v38  ;;  %1280 = verf.f32 %v847_v13  ;;  %v834_v15 = vmul.f32 0.5, %v798_v38 }
 0x1f9   :  { %1282 = verf.f32 %v850_v31 }
 0x1fa   :  { %1284 = verf.f32 %v846_v61 }
 0x1fb   :  { %1286 = verf.f32 %v845_v16 }
 0x1fc   :  { %1288 = verf.f32 %v852_v10 }
 0x1fd   :  { %1290 = verf.f32 %v851_v1 }
 0x202   :  { %v1277_v40 = vpop.eup %1276 }
 0x203   :  { %v1279_v30 = vpop.eup %1278  ;;  %v881_v47 = vadd.f32 1.0, %v1277_v40 }
 0x204   :  { %v1281_v17 = vpop.eup %1280  ;;  %v880_v8 = vadd.f32 1.0, %v1279_v30 }
 0x205   :  { %v897_v34 = vmul.f32 %v881_v47, %v833_v46  ;;  %v879_v43 = vadd.f32 1.0, %v1281_v17 }
 0x206   :  { %v1283_v27 = vpop.eup %1282  ;;  %v896_v49 = vmul.f32 %v880_v8, %v832_v7 }
 0x207   :  { %v882_v60 = vadd.f32 1.0, %v1283_v27  ;;  %v1285_v14 = vpop.eup %1284  ;;  %v920_v48 = vmul.f32 %v1853_v12, %v897_v34  ;;  %v895_v56 = vmul.f32 %v879_v43, %v831_v37 }
 0x208   :  { %v1287_v11 = vpop.eup %1286  ;;  %v878_v58 = vadd.f32 1.0, %v1285_v14  ;;  %v919_v4 = vmul.f32 %v1853_v12, %v896_v49 }
 0x209   :  { %v898_v26 = vmul.f32 %v882_v60, %v834_v15  ;;  %944 = vadd.xlane.f32.xlu1 %v920_v48  ;;  %v1289_v6 = vpop.eup %1288  ;;  %v877_v44 = vadd.f32 1.0, %v1287_v11  ;;  %v918_v22 = vmul.f32 %v1853_v12, %v895_v56  ;;  %v1891_v56 = vstv %s1949_s6  ;;  %s1327_s6 = smov [#allocation3]  }
 0x20a   :  { %v1291_v19 = vpop.eup %1290  ;;  %v894_v29 = vmul.f32 %v878_v58, %v830_v51  ;;  %v884_v63 = vadd.f32 1.0, %v1289_v6  ;;  %s1113_s30 = sshll.u32 %s1327_s6, 4  ;;  %s1114_s30 = int_to_ptr.vmem [resolvable:$true] %s1113_s30 }
 0x20b   :  { %v921_v62 = vmul.f32 %v1853_v12, %v898_v26  ;;  %v893_v57 = vmul.f32 %v877_v44, %v829_v53  ;;  %v883_v35 = vadd.f32 1.0, %v1291_v19  ;;  %s1300_s8 = scalar_lea.vmem %s1114_s30, 16  ;;  %s1304_s9 = scalar_lea.vmem %s1114_s30, 32 }
 0x20c   :  { %v917_v0 = vmul.f32 %v1853_v12, %v894_v29  ;;  %v900_v20 = vmul.f32 %v884_v63, %v836_v50  ;;  %p1301_p0 = scmp.ne.s32.totalorder %s1114_s30, %s1300_s8  ;;  %p1305_p1 = scmp.lt.s32.totalorder %s1114_s30, %s1114_s30 }
 0x20d   :  { %946 = vadd.xlane.f32.xlu0 %v921_v62  ;;  %930 = vadd.xlane.f32.xlu1 %v913_v9  ;;  %v899_v2 = vmul.f32 %v883_v35, %v835_v42  ;;  %v916_v24 = vmul.f32 %v1853_v12, %v893_v57  ;;  %v1885_v62 = vand.u32 127, %v126_v52  ;;  %p1306_p2 = scmp.lt.s32.totalorder %s1304_s9, %s1300_s8 }
 0x20e   :  { %v923_v41 = vmul.f32 %v1853_v12, %v900_v20 }
 0x20f   :  { %v922_v54 = vmul.f32 %v1853_v12, %v899_v2  ;;  %v1000_v58 = vadd.s32 4294967288, %v1885_v62  ;;  %v1007_v9 = vadd.s32 4294967280, %v1885_v62  ;;  %v998_v52 = vsub.s32 %v1885_v62, %v1607_v55  ;;  %p1307_p3 = por %p1306_p2, %p1305_p1 }
 0x210   :  { %v1021_v53 = vadd.s32 4294967264, %v1885_v62  ;;  %v1028_v50 = vadd.s32 4294967256, %v1885_v62 }
 0x211   :  { %942 = vadd.xlane.f32.xlu0 %v919_v4  ;;  %940 = vadd.xlane.f32.xlu1 %v918_v22  ;;  %v1014_v4 = vadd.s32 4294967272, %v1885_v62  ;;  %v1010_v57 = vsub.s32 %v1007_v9, %v1607_v55  ;;  %p1308_p4 = pnand %p1307_p3, %p1301_p0 }
 0x213   :  { %v1017_v2 = vsub.s32 %v1014_v4, %v1607_v55 }
 0x215   :  { %938 = vadd.xlane.f32.xlu0 %v917_v0  ;;  %936 = vadd.xlane.f32.xlu1 %v916_v24  ;;  %v1024_v0 = vsub.s32 %v1021_v53, %v1607_v55 }
 0x219   :  { %950 = vadd.xlane.f32.xlu0 %v923_v41  ;;  %948 = vadd.xlane.f32.xlu1 %v922_v54 }
 0x229   :  { %v1178_v28 = vpop.f32.mrf.mxu1 }
 0x22a   :  { %v819_v18 = vadd.f32 %v1178_v28, %v1845_v39  ;;  %v1031_v28 = vsub.s32 %v1028_v50, %v1607_v55 }
 0x22b   :  { %v810_v45 = vpop.f32.mrf.mxu1 }
 0x22c   :  { %v855_v13 = vmul.f32 0.70710677, %v819_v18  ;;  %v811_v5 = vadd.f32 %v1845_v39, %v810_v45  ;;  %v839_v3 = vmul.f32 0.5, %v819_v18 }
 0x22d   :  { %v1179_v33 = vpop.f32.mrf.mxu1 }
 0x22e   :  { %1292 = verf.f32 %v855_v13  ;;  %v853_v36 = vmul.f32 0.70710677, %v811_v5  ;;  %v822_v38 = vadd.f32 %v1179_v33, %v1845_v39  ;;  %v837_v32 = vmul.f32 0.5, %v811_v5 }
 0x22f   :  { %v813_v61 = vpop.f32.mrf.mxu1  ;;  %v1035_v13 = vadd.s32 4294967248, %v1885_v62 }
 0x230   :  { %1294 = verf.f32 %v853_v36  ;;  %v856_v21 = vmul.f32 0.70710677, %v822_v38  ;;  %v814_v31 = vadd.f32 %v1845_v39, %v813_v61  ;;  %v840_v60 = vmul.f32 0.5, %v822_v38 }
 0x231   :  { %v1042_v36 = vadd.s32 4294967240, %v1885_v62 }
 0x232   :  { %1296 = verf.f32 %v856_v21  ;;  %v854_v16 = vmul.f32 0.70710677, %v814_v31  ;;  %v838_v17 = vmul.f32 0.5, %v814_v31  ;;  %v1038_v21 = vsub.s32 %v1035_v13, %v1607_v55 }
 0x234   :  { %1298 = verf.f32 %v854_v16 }
 0x23b   :  { %v1293_v59 = vpop.eup %1292 }
 0x23c   :  { %v887_v1 = vadd.f32 1.0, %v1293_v59  ;;  %v1049_v59 = vadd.s32 4294967232, %v1885_v62 }
 0x23d   :  { %v1295_v10 = vpop.eup %1294 }
 0x23e   :  { %v885_v40 = vadd.f32 1.0, %v1295_v10  ;;  %v903_v27 = vmul.f32 %v887_v1, %v839_v3  ;;  %v1045_v10 = vsub.s32 %v1042_v36, %v1607_v55  ;;  %v1052_v3 = vsub.s32 %v1049_v59, %v1607_v55 }
 0x23f   :  { %v1297_v30 = vpop.eup %1296 }
 0x240   :  { %v901_v46 = vmul.f32 %v885_v40, %v837_v32  ;;  %v888_v15 = vadd.f32 1.0, %v1297_v30  ;;  %v926_v14 = vmul.f32 %v1853_v12, %v903_v27  ;;  %v1056_v30 = vadd.s32 4294967224, %v1885_v62 }
 0x241   :  { %v1299_v47 = vpop.eup %1298  ;;  %v1063_v27 = vadd.s32 4294967216, %v1885_v62 }
 0x242   :  { %v924_v25 = vmul.f32 %v1853_v12, %v901_v46  ;;  %v886_v34 = vadd.f32 1.0, %v1299_v47  ;;  %v904_v23 = vmul.f32 %v888_v15, %v840_v60 }
 0x244   :  { %952 = vadd.xlane.f32.xlu1 %v924_v25  ;;  %v902_v39 = vmul.f32 %v886_v34, %v838_v17  ;;  %v927_v43 = vmul.f32 %v1853_v12, %v904_v23  ;;  %v1059_v25 = vsub.s32 %v1056_v30, %v1607_v55 }
 0x246   :  { %v925_v8 = vmul.f32 %v1853_v12, %v902_v39  ;;  %v1003_v12 = vsub.s32 %v1000_v58, %v1607_v55 }
 0x248   :  { %954 = vadd.xlane.f32.xlu0 %v925_v8  ;;  %956 = vadd.xlane.f32.xlu1 %v926_v14  ;;  %v1070_v8 = vadd.s32 4294967208, %v1885_v62  ;;  %v1077_v14 = vadd.s32 4294967200, %v1885_v62 }
 0x24c   :  { %958 = vadd.xlane.f32.xlu0 %v927_v43 }
 0x266   :  { %v933_v48 = vpop.xlane.xlu0 %932 }
 0x267   :  { %v964_v35 = vadd.f32 %v1891_v56, %v933_v48  ;;  %v1066_v48 = vsub.s32 %v1063_v27, %v1607_v55 }
 0x269   :  { %v1011_v54 = vrot.slane %v964_v35, %v1010_v57 }
 0x26a   :  { %v929_v11 = vpop.xlane.xlu0 %928 }
 0x26b   :  { %v962_v51 = vadd.f32 %v1891_v56, %v929_v11 }
 0x26d   :  { %v999_v22 = vrot.slane %v962_v51, %v998_v52  ;;  %v1098_v51 = vadd.s32 4294967176, %v1885_v62 }
 0x26e   :  { %v935_v26 = vpop.xlane.xlu0 %934 }
 0x26f   :  { %v965_v24 = vadd.f32 %v1891_v56, %v935_v26  ;;  %v1084_v26 = vadd.s32 4294967192, %v1885_v62 }
 0x271   :  { %v1018_v33 = vrot.slane %v965_v24, %v1017_v2  ;;  %v1087_v52 = vsub.s32 %v1084_v26, %v1607_v55 }
 0x292   :  { %v945_v7 = vpop.xlane.xlu1 %944 }
 0x293   :  { %v970_v46 = vadd.f32 %v1891_v56, %v945_v7 }
 0x295   :  { %v1053_v39 = vrot.slane %v970_v46, %v1052_v3 }
 0x296   :  { %v931_v37 = vpop.xlane.xlu1 %930  ;;  %v947_v49 = vpop.xlane.xlu0 %946 }
 0x297   :  { %v963_v44 = vadd.f32 %v1891_v56, %v931_v37  ;;  %v971_v34 = vadd.f32 %v1891_v56, %v947_v49  ;;  %v1073_v37 = vsub.s32 %v1070_v8, %v1607_v55  ;;  %v1080_v49 = vsub.s32 %v1077_v14, %v1607_v55 }
 0x299   :  { %v1004_v29 = vrot.slane %v963_v44, %v1003_v12  ;;  %v1060_v7 = vrot.slane %v971_v34, %v1059_v25 }
 0x29a   :  { %v941_v6 = vpop.xlane.xlu1 %940  ;;  %v943_v19 = vpop.xlane.xlu0 %942 }
 0x29b   :  { %v1006_v41 = vsel %vm1005_vm0, %v1004_v29, %v999_v22  ;;  %v968_v31 = vadd.f32 %v1891_v56, %v941_v6  ;;  %v969_v1 = vadd.f32 %v1891_v56, %v943_v19  ;;  %v1091_v6 = vadd.s32 4294967184, %v1885_v62 }
 0x29c   :  { %v1013_v45 = vsel %vm1012_vm1, %v1011_v54, %v1006_v41 }
 0x29d   :  { %v1020_v61 = vsel %vm1019_vm2, %v1018_v33, %v1013_v45  ;;  %v1039_v40 = vrot.slane %v968_v31, %v1038_v21  ;;  %v1046_v17 = vrot.slane %v969_v1, %v1045_v10 }
 0x29e   :  { %v937_v63 = vpop.xlane.xlu1 %936  ;;  %v939_v42 = vpop.xlane.xlu0 %938 }
 0x29f   :  { %v966_v20 = vadd.f32 %v1891_v56, %v937_v63  ;;  %v967_v18 = vadd.f32 %v1891_v56, %v939_v42  ;;  %v1094_v63 = vsub.s32 %v1091_v6, %v1607_v55 }
 0x2a1   :  { %v1025_v5 = vrot.slane %v966_v20, %v1024_v0  ;;  %v1032_v38 = vrot.slane %v967_v18, %v1031_v28  ;;  %v1101_v20 = vsub.s32 %v1098_v51, %v1607_v55 }
 0x2a2   :  { %v949_v60 = vpop.xlane.xlu1 %948  ;;  %v951_v23 = vpop.xlane.xlu0 %950 }
 0x2a3   :  { %v1027_v16 = vsel %vm1026_vm3, %v1025_v5, %v1020_v61  ;;  %v972_v11 = vadd.f32 %v1891_v56, %v949_v60  ;;  %v973_v12 = vadd.f32 %v1891_v56, %v951_v23 }
 0x2a4   :  { %v1034_v32 = vsel %vm1033_vm4, %v1032_v38, %v1027_v16 }
 0x2a5   :  { %v1041_v47 = vsel %vm1040_vm5, %v1039_v40, %v1034_v32  ;;  %v1067_v19 = vrot.slane %v972_v11, %v1066_v48  ;;  %v1074_v35 = vrot.slane %v973_v12, %v1073_v37 }
 0x2a6   :  { %v1048_v15 = vsel %vm1047_vm6, %v1046_v17, %v1041_v47 }
 0x2a7   :  { %v1055_v43 = vsel %vm1054_vm7, %v1053_v39, %v1048_v15 }
 0x2a8   :  { %v1062_v44 = vsel %vm1061_vm8, %v1060_v7, %v1055_v43 }
 0x2a9   :  { %v1069_v53 = vsel %vm1068_vm9, %v1067_v19, %v1062_v44 }
 0x2aa   :  { %v1076_v42 = vsel %vm1075_vm10, %v1074_v35, %v1069_v53 }
 0x2cd   :  { %v953_v58 = vpop.xlane.xlu1 %952 }
 0x2ce   :  { %v974_v9 = vadd.f32 %v1891_v56, %v953_v58 }
 0x2d0   :  { %v1081_v4 = vrot.slane %v974_v9, %v1080_v49 }
 0x2d1   :  { %v955_v29 = vpop.xlane.xlu0 %954  ;;  %v957_v57 = vpop.xlane.xlu1 %956 }
 0x2d2   :  { %v975_v22 = vadd.f32 %v1891_v56, %v955_v29  ;;  %v976_v50 = vadd.f32 %v1891_v56, %v957_v57  ;;  %v1083_v2 = vsel %vm1082_vm11, %v1081_v4, %v1076_v42 }
 0x2d4   :  { %v1088_v0 = vrot.slane %v975_v22, %v1087_v52  ;;  %v1095_v62 = vrot.slane %v976_v50, %v1094_v63 }
 0x2d5   :  { %v959_v24 = vpop.xlane.xlu0 %958 }
 0x2d6   :  { %v977_v41 = vadd.f32 %v1891_v56, %v959_v24  ;;  %v1090_v54 = vsel %vm1089_vm12, %v1088_v0, %v1083_v2 }
 0x2d7   :  { %v1097_v18 = vsel %vm1096_vm13, %v1095_v62, %v1090_v54 }
 0x2d8   :  { %v1102_v28 = vrot.slane %v977_v41, %v1101_v20 }
 0x2da   :  { %v1104_v45 = vsel %vm1103_vm14, %v1102_v28, %v1097_v18 }
 0x2db   :  { %1106 = vst [vmem:[#allocation3] sm:$0x1] %v1104_v45 }
 0x2dc   :  { %1311 = shalt.err (!%p1308_p4)
}
 0x2dd   :  { %1116 = dma.vmem_to_hbm [thread:$0]  %s1114_s30, 16, %s1950_s7, [#allocation4]  }
 0x2de   :  { %1320 = dma.done.wait [#allocation4], 16  }
 0x2df   :  { %1321 = vsyncadd [#allocation4], 4294967280 }
 0x2e0   :  { %1120 = vsyncpa [#allocation4], 1 }

</bundles_post_ra>
